<compile_context>
chip_gen: v6e
topology: v6e:2x2x1
jax: 0.10.0
libtpu: 0.0.40
codegen_flags: <defaults>
</compile_context>

<pallas_src>
import functools

import jax
import jax.numpy as jnp
from jax.experimental import pallas as pl
from jax.experimental.pallas import tpu as pltpu


def _pow_static(x, k):
    """x ** k for a static python int k >= 1 (exponentiation by squaring)."""
    acc = None
    base = x
    while k > 0:
        if k & 1:
            acc = base if acc is None else acc * base
        k >>= 1
        if k:
            base = base * base
    return acc


def _diffused_attention_kernel(h_ref, att_ref, out_ref, *, alpha, K):
    # S = H @ att: bf16 operands -> single MXU pass; f32 accumulation.
    s = jnp.dot(h_ref[...].astype(jnp.bfloat16), att_ref[...],
                preferred_element_type=jnp.float32)

    # Row-wise numerically stable softmax.  The max stays on the XLU; the
    # denominator rides the (mostly idle) MXU as a matvec against a ones
    # vector so the XLU slot does not become the saturating slot on v7x.
    s_max = jnp.max(s, axis=-1, keepdims=True)
    e = jnp.exp(s - s_max)
    ones = jnp.ones((e.shape[-1], 1), dtype=e.dtype)
    denom = jnp.dot(e, ones, preferred_element_type=jnp.float32)
    a = e * pl.reciprocal(denom, approx=False)   # exact recip; EUP has slack

    if K <= 0:
        out_ref[...] = h_ref[...].astype(out_ref.dtype)
    else:
        # Collapsed K-step diffusion: Z = H * g**K, g = alpha + (1-alpha)*A.
        g = alpha + (1.0 - alpha) * a
        gk = _pow_static(g, K)
        # Re-read H from the (still resident) input block instead of keeping
        # it live across the matmul + softmax dependency chain.
        out_ref[...] = (h_ref[...] * gk).astype(out_ref.dtype)


def _round_up(x, m):
    return ((x + m - 1) // m) * m


def _choose_tile_m(N, target=1024):
    """~`target` rows per tile (near HBM roofline), >= 2 grid steps so v7x's
    two TensorCores both get work, multiple of 8 (f32 sublane)."""
    n_tiles = pl.cdiv(N, target)
    if N > 8:
        n_tiles = max(n_tiles, 2)
    if n_tiles > 2:
        n_tiles = _round_up(n_tiles, 2)   # even step count balances the 2 TCs
    return max(_round_up(pl.cdiv(N, n_tiles), 8), 8)


def diffused_attention(H, att, *, alpha, K, tile_m=None):
    """H: (N, D) float32, att: (D, D) float32 -> (N, D) float32."""
    N, D = H.shape
    assert att.shape == (D, D)

    if tile_m is None:
        tile_m = _choose_tile_m(N)
    else:
        tile_m = max(_round_up(min(tile_m, _round_up(N, 8)), 8), 8)
    grid_m = pl.cdiv(N, tile_m)   # ragged tail -> partial last block (masked)

    # att is tiny, loop-invariant and consumed in bf16 by the MXU: cast once
    # at the boundary (also halves its HBM bytes).
    att_b = att.astype(jnp.bfloat16)
    # TODO(synk): optionally take/return bf16 activations for v5e/v6e HBM
    # savings if the surrounding model tolerates it; kept f32 I/O here.

    kernel = functools.partial(
        _diffused_attention_kernel, alpha=float(alpha), K=int(K))

    cost = pl.CostEstimate(
        flops=2 * N * D * D + 2 * N * D + (K + 6) * N * D,
        bytes_accessed=2 * N * D * 4 + D * D * 2,
        transcendentals=N * D + N,
    )

    compiler_kwargs = dict(dimension_semantics=("parallel",))
    # Double-buffered in+out row tiles + resident att; only raise the scoped
    # VMEM limit when a caller forces tiles big enough to trip v5e's 16 MiB
    # default (auto tiling stays well below it).
    tile_vmem = 4 * tile_m * D * 4 + 2 * D * D * 2
    if tile_vmem > (12 << 20):
        compiler_kwargs["vmem_limit_bytes"] = min(
            tile_vmem + (4 << 20), 48 << 20)   # stay under v7x's 64 MiB

    return pl.pallas_call(
        kernel,
        out_shape=jax.ShapeDtypeStruct((N, D), H.dtype),
        grid_spec=pltpu.PrefetchScalarGridSpec(
            num_scalar_prefetch=0,
            grid=(grid_m,),
            in_specs=[
                pl.BlockSpec((tile_m, D), lambda i: (i, 0)),  # H row tile
                pl.BlockSpec((D, D), lambda i: (0, 0)),       # att, VMEM-resident
            ],
            out_specs=pl.BlockSpec((tile_m, D), lambda i: (i, 0)),
        ),
        compiler_params=pltpu.CompilerParams(**compiler_kwargs),
        cost_estimate=cost,
    )(H, att_b)


def _reference(H, att, alpha, K):
    s = H @ att
    a = jax.nn.softmax(s, axis=-1)
    z = H
    for _ in range(K):
        z = alpha * z + (1.0 - alpha) * (a * z)
    return z


if __name__ == "__main__":
    # Deterministic parameter / input setup.
    node_dim = 128
    N = 200          # exercises the ragged (partial) last block + 2-step grid
    alpha = 0.1
    theta = 0.5      # unused in forward (matches the PyTorch module)
    K = 4

    key = jax.random.PRNGKey(0)
    k_h, k_att = jax.random.split(key)

    # Xavier-uniform init of att with gain=1.414 (as nn.init.xavier_uniform_).
    gain = 1.414
    bound = gain * (6.0 / (node_dim + node_dim)) ** 0.5
    att = jax.random.uniform(
        k_att, (node_dim, node_dim), dtype=jnp.float32,
        minval=-bound, maxval=bound)

    H = jax.random.normal(k_h, (N, node_dim), dtype=jnp.float32)

    out = diffused_attention(H, att, alpha=alpha, K=K)   # auto tile_m
    out = jax.block_until_ready(out)

    ref = _reference(H, att, alpha, K)
    assert out.shape == (N, node_dim)
    # Tolerance covers bf16 rounding of the MXU matmul operands (logits carry
    # ~4e-3 relative error before the softmax); everything downstream is f32
    # with an exact reciprocal normalization.
    assert jnp.allclose(out, ref, atol=5e-3, rtol=5e-3), "mismatch vs reference"

    print("KERNEL_OK")
</pallas_src>

<mosaic_0001>
module attributes {stable_mosaic.version = 11 : i64} {
  func.func @_diffused_attention_kernel(%arg0: i32, %arg1: memref<104x128xf32, #tpu.memory_space<vmem>>, %arg2: memref<128x128xbf16, #tpu.memory_space<vmem>>, %arg3: memref<104x128xf32, #tpu.memory_space<vmem>>) attributes {dimension_semantics = [#tpu.dimension_semantics<parallel>], iteration_bounds = array<i64: 2>, scalar_prefetch = 0 : i64, scratch_operands = 0 : i64, tpu.core_type = #tpu.core_type<tc>, window_params = [{transform_indices = @transform_0, window_bounds = array<i64: 104, 128>}, {pipeline_mode = #tpu.pipeline_mode<synchronous>, transform_indices = @transform_1, window_bounds = array<i64: 128, 128>}, {transform_indices = @transform_2, window_bounds = array<i64: 104, 128>}]} {
    %c0 = arith.constant 0 : index
    %c0_0 = arith.constant 0 : index
    %0 = vector.load %arg1[%c0, %c0_0] : memref<104x128xf32, #tpu.memory_space<vmem>>, vector<104x128xf32>
    %1 = arith.truncf %0 : vector<104x128xf32> to vector<104x128xbf16>
    %c0_1 = arith.constant 0 : index
    %c0_2 = arith.constant 0 : index
    %2 = vector.load %arg2[%c0_1, %c0_2] : memref<128x128xbf16, #tpu.memory_space<vmem>>, vector<128x128xbf16>
    %cst = arith.constant dense<0.000000e+00> : vector<104x128xf32>
    %3 = tpu.matmul %1, %2, %cst {dimension_numbers = #tpu.dot_dimension_numbers<[1], [0], [0], [1], [0, 0, 1, 1], [], []>} : vector<104x128xbf16>, vector<128x128xbf16>, vector<104x128xf32> -> vector<104x128xf32>
    %cst_3 = arith.constant dense<0xFF800000> : vector<104xf32>
    %4 = vector.multi_reduction <maximumf>, %3, %cst_3 [1] : vector<104x128xf32> to vector<104xf32>
    %5 = vector.shape_cast %4 : vector<104xf32> to vector<104x1xf32>
    %6 = vector.broadcast %5 : vector<104x1xf32> to vector<104x128xf32>
    %7 = arith.subf %3, %6 : vector<104x128xf32>
    %8 = math.exp %7 : vector<104x128xf32>
    %cst_4 = arith.constant 1.000000e+00 : f32
    %9 = vector.broadcast %cst_4 : f32 to vector<128x1xf32>
    %cst_5 = arith.constant dense<0.000000e+00> : vector<104x1xf32>
    %10 = tpu.matmul %8, %9, %cst_5 {dimension_numbers = #tpu.dot_dimension_numbers<[1], [0], [0], [1], [0, 0, 1, 1], [], []>} : vector<104x128xf32>, vector<128x1xf32>, vector<104x1xf32> -> vector<104x1xf32>
    %11 = tpu.reciprocal %10 : vector<104x1xf32> -> vector<104x1xf32>
    %12 = vector.broadcast %11 : vector<104x1xf32> to vector<104x128xf32>
    %13 = arith.mulf %8, %12 : vector<104x128xf32>
    %cst_6 = arith.constant 0.899999976 : f32
    %14 = vector.broadcast %cst_6 : f32 to vector<104x128xf32>
    %15 = arith.mulf %14, %13 : vector<104x128xf32>
    %cst_7 = arith.constant 1.000000e-01 : f32
    %16 = vector.broadcast %cst_7 : f32 to vector<104x128xf32>
    %17 = arith.addf %16, %15 : vector<104x128xf32>
    %18 = arith.mulf %17, %17 : vector<104x128xf32>
    %19 = arith.mulf %18, %18 : vector<104x128xf32>
    %c0_8 = arith.constant 0 : index
    %c0_9 = arith.constant 0 : index
    %20 = vector.load %arg1[%c0_8, %c0_9] : memref<104x128xf32, #tpu.memory_space<vmem>>, vector<104x128xf32>
    %21 = arith.mulf %20, %19 : vector<104x128xf32>
    %c0_10 = arith.constant 0 : index
    %c0_11 = arith.constant 0 : index
    %22 = vector.load %arg3[%c0_10, %c0_11] : memref<104x128xf32, #tpu.memory_space<vmem>>, vector<104x128xf32>
    tpu.vector_store %arg3[%c0_10, %c0_11], %21 {strides = array<i32>} : memref<104x128xf32, #tpu.memory_space<vmem>>, vector<104x128xf32>,
    return
  }
  func.func @transform_0(%arg0: i32) -> (i32, i32) {
    %c0_i32 = arith.constant 0 : i32
    %c0_i32_0 = arith.constant 0 : i32
    return %arg0, %c0_i32 : i32, i32
  }
  func.func @transform_1(%arg0: i32) -> (i32, i32) {
    %c0_i32 = arith.constant 0 : i32
    %c0_i32_0 = arith.constant 0 : i32
    %c0_i32_1 = arith.constant 0 : i32
    return %c0_i32, %c0_i32_0 : i32, i32
  }
  func.func @transform_2(%arg0: i32) -> (i32, i32) {
    %c0_i32 = arith.constant 0 : i32
    %c0_i32_0 = arith.constant 0 : i32
    return %arg0, %c0_i32 : i32, i32
  }
}

</mosaic_0001>

<bundles_post_ra>
// kernel: tpu_custom_call.1
= control target key start
LH: loop header
LB: loop body
LE: loop exit
PB: predicated region body
PF: predicated region fallthrough
CT: control target
= control target key end

     0   :  { %7 = vsyncpa [#allocation3], 0  ;;  %s1711_s0 = inlined_call_operand.hbm [shape: f32[200,128], index: 0, kind: input, shape index: {}]   ;;  %s1712_s1 = inlined_call_operand.hbm [shape: bf16[128,128], index: 1, kind: input, shape index: {}]   ;;  %s1713_s2 = inlined_call_operand.hbm [shape: f32[200,128], index: 2, kind: output, shape index: {}]  }
   0x1   :  { %9 = vsyncpa [#allocation3 + $0x1], 0 }
   0x2   :  { %10 = vsyncpa [#allocation6], 0 }
   0x3   :  { %11 = vsyncpa [#allocation4], 0 }
   0x4   :  { %13 = vsyncpa [#allocation4 + $0x1], 0  ;;  %s1294_s9 = smov 0   ;;  %s1296_s10 = smov 0  }
   0x5   :  { %s1298_s11 = smov 0   ;;  %s1300_s12 = smov 0  }
   0x6 LB: > { %s1315_s13 = sadd.s32 4294967295, %s1264_s12   ;;  %s833_s14 = sadd.s32 4294967294, %s1264_s12   ;;  %s1264_s12 = sphi %s1300_s12, %s1728_s12   ;;  %s1260_s11 = sphi %s1298_s11, %s1727_s11   ;;  %s1256_s10 = sphi %s1296_s10, %s1726_s10   ;;  %s1252_s9 = sphi %s1294_s9, %s1725_s9  }
   0x7   : > { %s1319_s15 = sadd.s32 1, %s1264_s12   ;;  %s26_s16 = sadd.s32 1, %s1260_s11 }
   0x8   : > { %s23_s17 = ssub.s32 %s1264_s12, %s1319_s15  ;;  %p33_p0 = scmp.ne.s32.totalorder %s1260_s11, %s1256_s10 }
   0x9   : > { %p24_p1 = scmp.eq.s32.totalorder %s23_s17, 0  ;;  %p34_p2 = scmp.eq.s32.totalorder %s1264_s12, 0 }
   0xa   : > { %p39_p3 = scmp.ne.s32.totalorder %s1256_s10, %s1252_s9  ;;  %p40_p4 = scmp.eq.s32.totalorder %s1315_s13, 0 }
   0xb   : > { %s1331_s18 = scalar_select %p24_p1, %s1260_s11, %s26_s16  }
   0xc   : > { %p1333_p5 = por %p34_p2, %p33_p0  ;;  %p1339_p6 = por %p40_p4, %p39_p3 }
   0xd   : > { %p84_p7 = scmp.eq.s32.totalorder %s1315_s13, 1  ;;  %p90_p8 = scmp.eq.s32.totalorder %s833_s14, 1 }
   0xe   : > { %s1717_s20 = scalar_select %p1339_p6, 1, 0 }
   0xf   : > { %p834_p9 = scmp.ge.s32.totalorder %s1264_s12, 1  ;;  %p97_p10 = scmp.lt.s32.totalorder %s1264_s12, 3 }
  0x10   : > { %p1346_p11 = por %p84_p7, %p33_p0  ;;  %p1350_p12 = por %p90_p8, %p39_p3 }
  0x11   : > { %p1354_p13 = pnand %p834_p9, %p97_p10  ;;  %s1266_s24 = smov [#allocation5]  }
  0x12   : > { %s1718_s21 = scalar_select %p1346_p11, 1, 0 }
  0x13   : > { %s1719_s22 = scalar_select %p1350_p12, 1, 0 }
  0x14   : > { %p1028_p1 = pneg %p1354_p13  ;;  %s109_s25 = sshll.u32 %s1266_s24, 4  ;;  %s110_s25 = int_to_ptr.vmem [resolvable:$true] %s109_s25 }
  0x15   : > { %s1155_s26 = scalar_lea.vmem %s110_s25, 1024  ;;  %p1163_p8 = scmp.lt.s32.totalorder %s110_s25, %s110_s25 }
  0x16   : > { %p1029_p2 = pnand %p1028_p1, %p40_p4  ;;  %p1156_p7 = scmp.ne.s32.totalorder %s110_s25, %s1155_s26 }
  0x17   : > { %p1164_p6 = scmp.lt.s32.totalorder %s1155_s26, %s1155_s26 }
  0x18   : > { %p1146_p0 = pneg %p1029_p2 }
  0x19   : > { %p1165_p12 = por %p1164_p6, %p1163_p8 }
  0x1a   : > { %p1158_p11 = pnand %p1156_p7, %p1146_p0 }
  0x1c   : > { %p1159_p3 = pneg %p1158_p11 }
  0x1e   : > { %p1166_p9 = pnand %p1165_p12, %p1159_p3 }
  0x20   : > { %1169 = shalt.err (!%p1166_p9)
}
  0x21   : > { %s1267_s27 = smov 64   ;;  %s1268_s28 = smov 4  }
  0x22   : > { %1031 = dma.hbm_to_vmem [thread:$0]  (!%p1029_p2), %s1712_s1, 1024, %s110_s25, [#allocation6], %s1267_s27, %s1267_s27, %s1268_s28  }
  0x23   : > { %p1715_p10 = scmp.ge.s32.totalorder %s1264_s12, 2 }
  0x25   : > { %119 = sbr.rel (%p1715_p10) target bundleno = 76 (0x4c), region = 20 }
  0x2a   : > { %122 = sbr.rel (!%p1333_p5) target bundleno = 76 (0x4c), region = 24  ;;  %s123_s3 = sand.u32 (%p1333_p5), 1, %s1260_s11  }
  0x2b   : > { %s128_s4 = smul.u32 (%p1333_p5), 13, %s1264_s12  ;;  %s1375_s14 = scalar_lea.sflag (%p1333_p5), [#allocation3], %s123_s3 }
  0x2c   : > { %s1020_s5 = smul.u32 (%p1333_p5), 104, %s123_s3 }
  0x2d   : > { %s129_s6 = ssub.s32 (%p1333_p5), 25, %s128_s4 }
  0x2e   : > { %p130_p6 = scmp.lt.s32.totalorder (%p1333_p5), %s129_s6, 13  ;;  %s127_s16 = scalar_lea.vmem (%p1333_p5), [#allocation2], %s1020_s5 }
  0x30   : > { %s1730_s6 = smov (!%p130_p6, %s129_s6), 13 }
  0x31   : > { %s1372_s7 = sshll.u32 %s1730_s6, 7 }
  0x32   : > { %s134_s8 = ssub.s32 1664, %s1372_s7 }
  0x33   : > { %135 = vsyncadd %s1375_s14, %s134_s8  ;;  %p838_p5 = scmp.ne.s32.totalorder %s1372_s7, 0  ;;  %s859_s17 = smul.u32 1664, %s1264_s12 }
  0x34   : > { %s140_s19 = sshll.u32 %s127_s16, 4  ;;  %s1174_s30 = scalar_lea.hbm %s1711_s0, 3200  ;;  %s1385_s19 = int_to_ptr.vmem [resolvable:$true] %s140_s19 }
  0x35   : > { %s1383_s26 = scalar_lea.hbm %s1711_s0, %s859_s17 }
  0x36   : > { %s1170_s27 = scalar_lea.hbm %s1383_s26, %s1372_s7  ;;  %p1175_p2 = scmp.lt.s32.totalorder %s1383_s26, %s1711_s0 }
  0x37   : > { %p1171_p11 = scmp.ne.s32.totalorder %s1383_s26, %s1170_s27  ;;  %p1176_p0 = scmp.lt.s32.totalorder %s1174_s30, %s1170_s27 }
  0x39   : > { %p1172_p12 = pnand %p1171_p11, %p838_p5  ;;  %p1177_p7 = por %p1176_p0, %p1175_p2 }
  0x3b   : > { %p1173_p1 = pneg %p1172_p12 }
  0x3d   : > { %p1178_p3 = pnand %p1177_p7, %p1173_p1 }
  0x3f   : > { %1181 = shalt.err (!%p1178_p3)
}
  0x40   : > { %s1182_s5 = scalar_lea.vmem %s1385_s19, %s1372_s7  ;;  %s1269_s6 = smov [#allocation2]  }
  0x41   : > { %p1183_p8 = scmp.ne.s32.totalorder %s1385_s19, %s1182_s5  ;;  %s1186_s8 = sshll.u32 %s1269_s6, 4  ;;  %s1187_s8 = int_to_ptr.vmem [resolvable:$false] %s1186_s8 }
  0x42   : > { %s1188_s16 = scalar_lea.vmem %s1187_s8, 3328  ;;  %p1189_p11 = scmp.lt.s32.totalorder %s1385_s19, %s1187_s8 }
  0x43   : > { %p1184_p9 = pnand %p1183_p8, %p838_p5  ;;  %p1190_p12 = scmp.lt.s32.totalorder %s1188_s16, %s1182_s5 }
  0x45   : > { %p1185_p6 = pneg %p1184_p9  ;;  %p1191_p10 = por %p1190_p12, %p1189_p11 }
  0x47   : > { %p1192_p2 = pnand %p1191_p10, %p1185_p6 }
  0x49   : > { %1195 = shalt.err (!%p1192_p2)
}
  0x4a   : > { %s1270_s17 = smov 128   ;;  %s1271_s24 = smov 8  }
  0x4b   : > { %146 = dma.hbm_to_vmem [thread:$0]  (%p838_p5), %s1383_s26, %s1372_s7, %s1385_s19, %s1375_s14, %s1270_s17, %s1270_s17, %s1271_s24  }
  0x4c PF: > { %152 = sbr.rel (%p1354_p13) target bundleno = 886 (0x376), region = 28  ;;  %s1414_s25 = sand.u32 (!%p1354_p13), 1, %s1256_s10  }
  0x4d   : > { %s1021_s27 = smul.u32 (!%p1354_p13), 104, %s1414_s25  ;;  %s155_s28 = scalar_lea.sflag (!%p1354_p13), [#allocation3], %s1414_s25 }
  0x4e   : > { %p1721_p10 = scmp.ne.s32.totalorder (!%p1354_p13), %s1717_s20, 0 }
  0x4f   : > { %s1420_s29 = scalar_lea.vmem (!%p1354_p13), [#allocation2], %s1021_s27 }
  0x51   : > { %1239 = dma.done.wait (%p1721_p10), %s155_s28, 1664  }
  0x52   : > { %1241 = vsyncadd (%p1721_p10), %s155_s28, 4294965632 }
  0x53   : > { %1243 = dma.done.wait (%p40_p4), [#allocation6], 1024  }
  0x54   : > { %1245 = vsyncadd (%p40_p4), [#allocation6], 4294966272  ;;  %v1272_v0 = vmov 0.0   ;;  %vm1273_vm0 = vmmov 0   ;;  %v1084_v1 = vld [vmem:[#allocation5 + $0x38] sm:$0xff]   ;;  %v1085_v2 = vld [vmem:[#allocation5 + $0x30] sm:$0xff]  }
  0x55   : > { %905 = vmatprep.subr.bf16.mxu0 %v1272_v0  ;;  %921 = vmatprep.mubr.msk.bf16.mxu0 %vm1273_vm0, %v1272_v0  ;;  %v1086_v3 = vld [vmem:[#allocation5 + $0x28] sm:$0xff]   ;;  %v1087_v4 = vld [vmem:[#allocation5 + $0x20] sm:$0xff]   ;;  %v1088_v5 = vld [vmem:[#allocation5 + $0x18] sm:$0xff]   ;;  %v1274_v29 = vmov 1.0   ;;  %s1612_s20 = scalar_lea.vmem [#allocation7], %s1021_s27  ;;  %s731_s23 = scalar_lea.sflag [#allocation4], %s1414_s25 }
  0x56   : > { %949 = vmatprep.subr.mxu1 %v1272_v0  ;;  %981 = vmatprep.mubr.msk.f32.mxu1 %vm1273_vm0, %v1272_v0  ;;  %v1089_v6 = vld [vmem:[#allocation5 + $0x10] sm:$0xff]   ;;  %v1090_v7 = vld [vmem:[#allocation5 + $0x8] sm:$0xff]   ;;  %v1091_v8 = vld [vmem:[#allocation5] sm:$0xff]   ;;  %p1722_p4 = scmp.ne.s32.totalorder %s1718_s21, 0 }
  0x57   : > { %906 = vmatpush3.bf16.msra.mxu0 %v1084_v1  ;;  %v1443_v9 = vld [vmem:[%s1420_s29] sm:$0xff]  ;;  %v1446_v10 = vld [vmem:[%s1420_s29 + $0x8] sm:$0xff]  ;;  %v1454_v12 = vld [vmem:[%s1420_s29 + $0x10] sm:$0xff]  ;;  %950 = vmatpush3.msra.mxu1 %v1274_v29  ;;  %s738_s7 = smul.u32 (%p1722_p4), 13, %s1315_s13 }
  0x58   : > { %907 = vmatprep.subr.bf16.mxu0 %v1272_v0  ;;  %v207_v11 = vpack.c.bf16 %v1446_v10, %v1443_v9  ;;  %v1457_v13 = vld [vmem:[%s1420_s29 + $0x18] sm:$0xff]  ;;  %v1464_v15 = vld [vmem:[%s1420_s29 + $0x20] sm:$0xff]  ;;  %v1467_v16 = vld [vmem:[%s1420_s29 + $0x28] sm:$0xff]  ;;  %951 = vmatprep.subr.mxu1 %v1272_v0 }
  0x59   : > { %v208_v14 = vpack.c.bf16 %v1457_v13, %v1454_v12  ;;  %v209_v17 = vpack.c.bf16 %v1467_v16, %v1464_v15  ;;  %v1474_v18 = vld [vmem:[%s1420_s29 + $0x30] sm:$0xff]  ;;  %v1477_v19 = vld [vmem:[%s1420_s29 + $0x38] sm:$0xff]  ;;  %v1484_v21 = vld [vmem:[%s1420_s29 + $0x40] sm:$0xff]  ;;  %952 = vmatpush3.msra.mxu1 %v1274_v29  ;;  %s739_s14 = ssub.s32 (%p1722_p4), 25, %s738_s7 }
  0x5a   : > { %v210_v20 = vpack.c.bf16 %v1477_v19, %v1474_v18  ;;  %v1487_v22 = vld [vmem:[%s1420_s29 + $0x48] sm:$0xff]  ;;  %v1494_v24 = vld [vmem:[%s1420_s29 + $0x50] sm:$0xff]  ;;  %v1497_v25 = vld [vmem:[%s1420_s29 + $0x58] sm:$0xff]  ;;  %953 = vmatprep.subr.mxu1 %v1272_v0  ;;  %p740_p13 = scmp.lt.s32.totalorder (%p1722_p4), %s739_s14, 13 }
  0x5b   : > { %908 = vmatpush3.bf16.msra.mxu0 %v1085_v2  ;;  %v211_v23 = vpack.c.bf16 %v1487_v22, %v1484_v21  ;;  %v212_v26 = vpack.c.bf16 %v1497_v25, %v1494_v24  ;;  %v1504_v27 = vld [vmem:[%s1420_s29 + $0x60] sm:$0xff]  ;;  %954 = vmatpush3.msra.mxu1 %v1274_v29 }
  0x5c   : > { %909 = vmatprep.subr.bf16.mxu0 %v1272_v0  ;;  %v213_v28 = vpack.c.bf16 %v1504_v27, %v1504_v27  ;;  %955 = vmatprep.subr.mxu1 %v1272_v0 }
  0x5d   : > { %956 = vmatpush3.msra.mxu1 %v1274_v29 }
  0x5e   : > { %957 = vmatprep.subr.mxu1 %v1272_v0 }
  0x5f   : > { %910 = vmatpush3.bf16.msra.mxu0 %v1086_v3  ;;  %958 = vmatpush3.msra.mxu1 %v1274_v29 }
  0x60   : > { %911 = vmatprep.subr.bf16.mxu0 %v1272_v0  ;;  %959 = vmatprep.subr.mxu1 %v1272_v0 }
  0x61   : > { %960 = vmatpush3.msra.mxu1 %v1274_v29 }
  0x62   : > { %961 = vmatprep.subr.mxu1 %v1272_v0 }
  0x63   : > { %912 = vmatpush3.bf16.msra.mxu0 %v1087_v4  ;;  %962 = vmatpush3.msra.mxu1 %v1274_v29 }
  0x64   : > { %913 = vmatprep.subr.bf16.mxu0 %v1272_v0  ;;  %963 = vmatprep.subr.mxu1 %v1272_v0 }
  0x65   : > { %964 = vmatpush3.msra.mxu1 %v1274_v29 }
  0x66   : > { %965 = vmatprep.subr.mxu1 %v1272_v0 }
  0x67   : > { %914 = vmatpush3.bf16.msra.mxu0 %v1088_v5  ;;  %966 = vmatpush3.msra.mxu1 %v1274_v29 }
  0x68   : > { %915 = vmatprep.subr.bf16.mxu0 %v1272_v0  ;;  %967 = vmatprep.subr.mxu1 %v1272_v0 }
  0x69   : > { %968 = vmatpush3.msra.mxu1 %v1274_v29 }
  0x6a   : > { %969 = vmatprep.subr.mxu1 %v1272_v0 }
  0x6b   : > { %916 = vmatpush3.bf16.msra.mxu0 %v1089_v6  ;;  %970 = vmatpush3.msra.mxu1 %v1274_v29 }
  0x6c   : > { %917 = vmatprep.subr.bf16.mxu0 %v1272_v0  ;;  %971 = vmatprep.subr.mxu1 %v1272_v0 }
  0x6d   : > { %972 = vmatpush3.msra.mxu1 %v1274_v29 }
  0x6e   : > { %973 = vmatprep.subr.mxu1 %v1272_v0 }
  0x6f   : > { %918 = vmatpush3.bf16.msra.mxu0 %v1090_v7  ;;  %974 = vmatpush3.msra.mxu1 %v1274_v29 }
  0x70   : > { %919 = vmatprep.subr.bf16.mxu0 %v1272_v0  ;;  %975 = vmatprep.subr.mxu1 %v1272_v0 }
  0x71   : > { %976 = vmatpush3.msra.mxu1 %v1274_v29 }
  0x72   : > { %977 = vmatprep.subr.mxu1 %v1272_v0 }
  0x73   : > { %920 = vmatpush3.bf16.msra.mxu0 %v1091_v8  ;;  %978 = vmatpush3.msra.mxu1 %v1274_v29 }
  0x74   : > { %979 = vmatprep.subr.mxu1 %v1272_v0 }
  0x75   : > { %980 = vmatpush3.msra.mxu1 %v1274_v29 }
  0x76   : > { %922 = vmatmul.mubr.bf16.vlgmr.msra.gmra.mxu0 %v207_v11 }
  0x77   : > { %925 = vmatprep.mubr.msk.bf16.mxu0 %vm1273_vm0, %v1272_v0 }
  0x7e   : > { %926 = vmatmul.mubr.bf16.gmra.mxu0 %v208_v14 }
  0x7f   : > { %929 = vmatprep.mubr.msk.bf16.mxu0 %vm1273_vm0, %v1272_v0 }
  0x86   : > { %930 = vmatmul.mubr.bf16.gmra.mxu0 %v209_v17 }
  0x87   : > { %933 = vmatprep.mubr.msk.bf16.mxu0 %vm1273_vm0, %v1272_v0 }
  0x8e   : > { %934 = vmatmul.mubr.bf16.gmra.mxu0 %v210_v20 }
  0x8f   : > { %937 = vmatprep.mubr.msk.bf16.mxu0 %vm1273_vm0, %v1272_v0 }
  0x96   : > { %938 = vmatmul.mubr.bf16.gmra.mxu0 %v211_v23 }
  0x97   : > { %941 = vmatprep.mubr.msk.bf16.mxu0 %vm1273_vm0, %v1272_v0 }
  0x9e   : > { %942 = vmatmul.mubr.bf16.gmra.mxu0 %v212_v26 }
  0x9f   : > { %945 = vmatprep.mubr.msk.bf16.mxu0 %vm1273_vm0, %v1272_v0 }
  0xa6   : > { %946 = vmatmul.mubr.bf16.gmra.mxu0 %v213_v28 }
 0x136   : > { %v312_v30 = vpop.f32.mrf.mxu0 }
 0x137   : > { %366 = vmax.xlane.f32.xlu0 %v312_v30 }
 0x138   : > { %v923_v31 = vpop.f32.mrf.mxu0 }
 0x13a   : > { %v315_v32 = vpop.f32.mrf.mxu0 }
 0x13b   : > { %368 = vmax.xlane.f32.xlu0 %v315_v32 }
 0x13c   : > { %v924_v33 = vpop.f32.mrf.mxu0 }
 0x13e   : > { %v320_v34 = vpop.f32.mrf.mxu0 }
 0x13f   : > { %370 = vmax.xlane.f32.xlu1 %v320_v34 }
 0x140   : > { %v927_v35 = vpop.f32.mrf.mxu0 }
 0x142   : > { %v323_v36 = vpop.f32.mrf.mxu0 }
 0x143   : > { %372 = vmax.xlane.f32.xlu1 %v323_v36 }
 0x144   : > { %v928_v37 = vpop.f32.mrf.mxu0 }
 0x146   : > { %v328_v38 = vpop.f32.mrf.mxu0 }
 0x147   : > { %374 = vmax.xlane.f32.xlu0 %v328_v38 }
 0x148   : > { %v931_v39 = vpop.f32.mrf.mxu0 }
 0x14a   : > { %v331_v40 = vpop.f32.mrf.mxu0 }
 0x14b   : > { %376 = vmax.xlane.f32.xlu1 %v331_v40 }
 0x14c   : > { %v932_v41 = vpop.f32.mrf.mxu0 }
 0x14e   : > { %v336_v42 = vpop.f32.mrf.mxu0 }
 0x14f   : > { %378 = vmax.xlane.f32.xlu0 %v336_v42 }
 0x150   : > { %v935_v43 = vpop.f32.mrf.mxu0 }
 0x152   : > { %v339_v44 = vpop.f32.mrf.mxu0 }
 0x153   : > { %380 = vmax.xlane.f32.xlu1 %v339_v44 }
 0x154   : > { %v936_v45 = vpop.f32.mrf.mxu0 }
 0x156   : > { %v1523_v46 = vpop.f32.mrf.mxu0 }
 0x157   : > { %382 = vmax.xlane.f32.xlu0 %v1523_v46 }
 0x158   : > { %v939_v47 = vpop.f32.mrf.mxu0 }
 0x15a   : > { %v1526_v48 = vpop.f32.mrf.mxu0 }
 0x15b   : > { %384 = vmax.xlane.f32.xlu1 %v1526_v48 }
 0x15c   : > { %v940_v49 = vpop.f32.mrf.mxu0 }
 0x15e   : > { %v1529_v50 = vpop.f32.mrf.mxu0 }
 0x15f   : > { %386 = vmax.xlane.f32.xlu0 %v1529_v50 }
 0x160   : > { %v943_v51 = vpop.f32.mrf.mxu0 }
 0x162   : > { %v1532_v52 = vpop.f32.mrf.mxu0 }
 0x163   : > { %388 = vmax.xlane.f32.xlu1 %v1532_v52 }
 0x164   : > { %v944_v53 = vpop.f32.mrf.mxu0 }
 0x166   : > { %v1535_v54 = vpop.f32.mrf.mxu0 }
 0x167   : > { %390 = vmax.xlane.f32.xlu0 %v1535_v54 }
 0x168   : > { %v947_v55 = vpop.f32.mrf.mxu0 }
 0x16a   : > { %v363_v56 = vpop.f32.mrf.mxu0 }
 0x16c   : > { %v948_v57 = vpop.f32.mrf.mxu0 }
 0x1c0   : > { %v367_v58 = vpop.xlane.xlu0 %366 }
 0x1c1   : > { %v392_v59 = vsub.f32 %v312_v30, %v367_v58 }
 0x1c3   : > { %v405_v60 = vmul.f32 1.442695, %v392_v59 }
 0x1c4   : > { %v369_v61 = vpop.xlane.xlu0 %368 }
 0x1c5   : > { %1092 = vpow2.f32 %v405_v60  ;;  %v393_v62 = vsub.f32 %v315_v32, %v369_v61  ;;  %v1275_v60 = vmov 0  }
 0x1c6   : > { %1082 = vset.pattern.permute.xlu1 %v1275_v60  ;;  %1083 = vset.pattern.permute.xlu0 %v1275_v60 }
 0x1c7   : > { %v407_v63 = vmul.f32 1.442695, %v393_v62 }
 0x1c8   : > { %v371_v1 = vpop.xlane.xlu1 %370 }
 0x1c9   : > { %1094 = vpow2.f32 %v407_v63  ;;  %v394_v2 = vsub.f32 %v320_v34, %v371_v1 }
 0x1cb   : > { %v409_v3 = vmul.f32 1.442695, %v394_v2 }
 0x1cc   : > { %v373_v4 = vpop.xlane.xlu1 %372 }
 0x1cd   : > { %1096 = vpow2.f32 %v409_v3  ;;  %v395_v5 = vsub.f32 %v323_v36, %v373_v4 }
 0x1cf   : > { %v411_v6 = vmul.f32 1.442695, %v395_v5 }
 0x1d0   : > { %v375_v7 = vpop.xlane.xlu0 %374 }
 0x1d1   : > { %1098 = vpow2.f32 %v411_v6  ;;  %v396_v8 = vsub.f32 %v328_v38, %v375_v7 }
 0x1d2   : > { %v1538_v11 = vpop.eup %1092 }
 0x1d3   : > { %v413_v14 = vmul.f32 1.442695, %v396_v8  ;;  %982 = vmatmul.mubr.f32.vlgmr.msra.gmra.mxu1 %v1538_v11 }
 0x1d4   : > { %v377_v17 = vpop.xlane.xlu1 %376  ;;  %984 = vmatprep.mubr.msk.f32.mxu1 %vm1273_vm0, %v1272_v0 }
 0x1d5   : > { %1100 = vpow2.f32 %v413_v14  ;;  %v397_v20 = vsub.f32 %v331_v40, %v377_v17 }
 0x1d6   : > { %v1543_v23 = vpop.eup %1094 }
 0x1d7   : > { %v415_v26 = vmul.f32 1.442695, %v397_v20  ;;  %985 = vmatmul.mubr.f32.gmra.mxu1 %v1543_v23 }
 0x1d8   : > { %v379_v28 = vpop.xlane.xlu0 %378  ;;  %987 = vmatprep.mubr.msk.f32.mxu1 %vm1273_vm0, %v1272_v0 }
 0x1d9   : > { %1102 = vpow2.f32 %v415_v26  ;;  %v398_v29 = vsub.f32 %v336_v42, %v379_v28 }
 0x1da   : > { %v1548_v30 = vpop.eup %1096 }
 0x1db   : > { %v417_v31 = vmul.f32 1.442695, %v398_v29  ;;  %988 = vmatmul.mubr.f32.gmra.mxu1 %v1548_v30 }
 0x1dc   : > { %v381_v32 = vpop.xlane.xlu1 %380  ;;  %990 = vmatprep.mubr.msk.f32.mxu1 %vm1273_vm0, %v1272_v0 }
 0x1dd   : > { %1104 = vpow2.f32 %v417_v31  ;;  %v399_v33 = vsub.f32 %v339_v44, %v381_v32 }
 0x1de   : > { %v1553_v34 = vpop.eup %1098 }
 0x1df   : > { %v419_v35 = vmul.f32 1.442695, %v399_v33  ;;  %991 = vmatmul.mubr.f32.gmra.mxu1 %v1553_v34 }
 0x1e0   : > { %v383_v36 = vpop.xlane.xlu0 %382  ;;  %993 = vmatprep.mubr.msk.f32.mxu1 %vm1273_vm0, %v1272_v0 }
 0x1e1   : > { %1106 = vpow2.f32 %v419_v35  ;;  %v400_v37 = vsub.f32 %v1523_v46, %v383_v36 }
 0x1e2   : > { %v1559_v38 = vpop.eup %1100 }
 0x1e3   : > { %v421_v39 = vmul.f32 1.442695, %v400_v37  ;;  %994 = vmatmul.mubr.f32.gmra.mxu1 %v1559_v38 }
 0x1e4   : > { %v385_v40 = vpop.xlane.xlu1 %384  ;;  %996 = vmatprep.mubr.msk.f32.mxu1 %vm1273_vm0, %v1272_v0 }
 0x1e5   : > { %1108 = vpow2.f32 %v421_v39  ;;  %v401_v41 = vsub.f32 %v1526_v48, %v385_v40 }
 0x1e6   : > { %v1565_v42 = vpop.eup %1102 }
 0x1e7   : > { %v423_v43 = vmul.f32 1.442695, %v401_v41  ;;  %997 = vmatmul.mubr.f32.gmra.mxu1 %v1565_v42 }
 0x1e8   : > { %v387_v44 = vpop.xlane.xlu0 %386  ;;  %999 = vmatprep.mubr.msk.f32.mxu1 %vm1273_vm0, %v1272_v0 }
 0x1e9   : > { %1110 = vpow2.f32 %v423_v43  ;;  %v402_v45 = vsub.f32 %v1529_v50, %v387_v44 }
 0x1ea   : > { %v1571_v46 = vpop.eup %1104 }
 0x1eb   : > { %v425_v47 = vmul.f32 1.442695, %v402_v45  ;;  %1000 = vmatmul.mubr.f32.gmra.mxu1 %v1571_v46 }
 0x1ec   : > { %v389_v49 = vpop.xlane.xlu1 %388  ;;  %1002 = vmatprep.mubr.msk.f32.mxu1 %vm1273_vm0, %v1272_v0 }
 0x1ed   : > { %1112 = vpow2.f32 %v425_v47  ;;  %v403_v48 = vsub.f32 %v1532_v52, %v389_v49 }
 0x1ee   : > { %v1577_v51 = vpop.eup %1106 }
 0x1ef   : > { %v427_v53 = vmul.f32 1.442695, %v403_v48  ;;  %1003 = vmatmul.mubr.f32.gmra.mxu1 %v1577_v51 }
 0x1f0   : > { %v391_v55 = vpop.xlane.xlu0 %390  ;;  %1005 = vmatprep.mubr.msk.f32.mxu1 %vm1273_vm0, %v1272_v0 }
 0x1f1   : > { %1114 = vpow2.f32 %v427_v53  ;;  %v404_v50 = vsub.f32 %v1535_v54, %v391_v55 }
 0x1f2   : > { %v1583_v56 = vpop.eup %1108 }
 0x1f3   : > { %v429_v57 = vmul.f32 1.442695, %v404_v50  ;;  %1006 = vmatmul.mubr.f32.gmra.mxu1 %v1583_v56 }
 0x1f4   : > { %1008 = vmatprep.mubr.msk.f32.mxu1 %vm1273_vm0, %v1272_v0 }
 0x1f5   : > { %1116 = vpow2.f32 %v429_v57 }
 0x1f6   : > { %v1588_v52 = vpop.eup %1110 }
 0x1f7   : > { %1009 = vmatmul.mubr.f32.gmra.mxu1 %v1588_v52 }
 0x1f8   : > { %1011 = vmatprep.mubr.msk.f32.mxu1 %vm1273_vm0, %v1272_v0 }
 0x1fa   : > { %v1593_v58 = vpop.eup %1112 }
 0x1fb   : > { %1012 = vmatmul.mubr.f32.gmra.mxu1 %v1593_v58 }
 0x1fc   : > { %1014 = vmatprep.mubr.msk.f32.mxu1 %vm1273_vm0, %v1272_v0 }
 0x1fe   : > { %v1598_v54 = vpop.eup %1114 }
 0x1ff   : > { %1015 = vmatmul.mubr.f32.gmra.mxu1 %v1598_v54 }
 0x200   : > { %1017 = vmatprep.mubr.msk.f32.mxu1 %vm1273_vm0, %v1272_v0 }
 0x202   : > { %v1603_v59 = vpop.eup %1116 }
 0x203   : > { %1018 = vmatmul.mubr.f32.gmra.mxu1 %v1603_v59 }
 0x293   : > { %v497_v61 = vpop.f32.mrf.mxu1 }
 0x294   : > { %1118 = vrcp.f32 %v497_v61 }
 0x295   : > { %v983_v62 = vpop.f32.mrf.mxu1 }
 0x297   : > { %v502_v63 = vpop.f32.mrf.mxu1 }
 0x298   : > { %1120 = vrcp.f32 %v502_v63 }
 0x299   : > { %v986_v1 = vpop.f32.mrf.mxu1 }
 0x29b   : > { %v507_v2 = vpop.f32.mrf.mxu1 }
 0x29c   : > { %1122 = vrcp.f32 %v507_v2 }
 0x29d   : > { %v989_v3 = vpop.f32.mrf.mxu1 }
 0x29f   : > { %v512_v4 = vpop.f32.mrf.mxu1 }
 0x2a0   : > { %1124 = vrcp.f32 %v512_v4 }
 0x2a1   : > { %v1119_v5 = vpop.eup %1118  ;;  %v992_v0 = vpop.f32.mrf.mxu1 }
 0x2a2   : > { %576 = vperm.xlu1 %1082, %v1119_v5  }
 0x2a3   : > { %v517_v6 = vpop.f32.mrf.mxu1 }
 0x2a4   : > { %1126 = vrcp.f32 %v517_v6 }
 0x2a5   : > { %v1121_v7 = vpop.eup %1120  ;;  %v995_v8 = vpop.f32.mrf.mxu1 }
 0x2a6   : > { %581 = vperm.xlu0 %1083, %v1121_v7  }
 0x2a7   : > { %v522_v14 = vpop.f32.mrf.mxu1 }
 0x2a8   : > { %1128 = vrcp.f32 %v522_v14 }
 0x2a9   : > { %v1123_v17 = vpop.eup %1122  ;;  %v998_v20 = vpop.f32.mrf.mxu1 }
 0x2aa   : > { %586 = vperm.xlu1 %1082, %v1123_v17  }
 0x2ab   : > { %v527_v26 = vpop.f32.mrf.mxu1 }
 0x2ac   : > { %1130 = vrcp.f32 %v527_v26 }
 0x2ad   : > { %v1125_v28 = vpop.eup %1124  ;;  %v1001_v29 = vpop.f32.mrf.mxu1 }
 0x2ae   : > { %591 = vperm.xlu1 %1082, %v1125_v28  }
 0x2af   : > { %v532_v31 = vpop.f32.mrf.mxu1 }
 0x2b0   : > { %1132 = vrcp.f32 %v532_v31 }
 0x2b1   : > { %v1127_v32 = vpop.eup %1126  ;;  %v1004_v33 = vpop.f32.mrf.mxu1 }
 0x2b2   : > { %596 = vperm.xlu1 %1082, %v1127_v32  }
 0x2b3   : > { %v537_v35 = vpop.f32.mrf.mxu1 }
 0x2b4   : > { %1134 = vrcp.f32 %v537_v35 }
 0x2b5   : > { %v1129_v36 = vpop.eup %1128  ;;  %v1007_v37 = vpop.f32.mrf.mxu1 }
 0x2b6   : > { %601 = vperm.xlu1 %1082, %v1129_v36  }
 0x2b7   : > { %v542_v39 = vpop.f32.mrf.mxu1 }
 0x2b8   : > { %1136 = vrcp.f32 %v542_v39 }
 0x2b9   : > { %v1131_v40 = vpop.eup %1130  ;;  %v1010_v41 = vpop.f32.mrf.mxu1 }
 0x2ba   : > { %606 = vperm.xlu1 %1082, %v1131_v40  }
 0x2bb   : > { %v547_v43 = vpop.f32.mrf.mxu1 }
 0x2bc   : > { %1138 = vrcp.f32 %v547_v43 }
 0x2bd   : > { %v1133_v44 = vpop.eup %1132  ;;  %v1013_v45 = vpop.f32.mrf.mxu1 }
 0x2be   : > { %611 = vperm.xlu1 %1082, %v1133_v44  }
 0x2bf   : > { %v552_v47 = vpop.f32.mrf.mxu1 }
 0x2c0   : > { %1140 = vrcp.f32 %v552_v47 }
 0x2c1   : > { %v1135_v49 = vpop.eup %1134  ;;  %v1016_v48 = vpop.f32.mrf.mxu1 }
 0x2c2   : > { %616 = vperm.xlu1 %1082, %v1135_v49  }
 0x2c3   : > { %v557_v53 = vpop.f32.mrf.mxu1 }
 0x2c4   : > { %1142 = vrcp.f32 %v557_v53 }
 0x2c5   : > { %v1137_v55 = vpop.eup %1136  ;;  %v1019_v50 = vpop.f32.mrf.mxu1 }
 0x2c6   : > { %621 = vperm.xlu1 %1082, %v1137_v55  }
 0x2c9   : > { %v1139_v57 = vpop.eup %1138 }
 0x2ca   : > { %626 = vperm.xlu0 %1083, %v1139_v57  }
 0x2cd   : > { %v1141_v60 = vpop.eup %1140 }
 0x2ce   : > { %631 = vperm.xlu1 %1082, %v1141_v60  }
 0x2d1   : > { %v1143_v61 = vpop.eup %1142 }
 0x2d2   : > { %636 = vperm.xlu0 %1083, %v1143_v61  }
 0x31d   : > { %v577_v62 = vpop.permute.xlu1 %576 }
 0x31e   : > { %v639_v63 = vmul.f32 %v1538_v11, %v577_v62 }
 0x320   : > { %v652_v1 = vmul.f32 0.9, %v639_v63 }
 0x321   : > { %v582_v2 = vpop.permute.xlu0 %581 }
 0x322   : > { %v665_v3 = vadd.f32 0.1, %v652_v1  ;;  %v640_v4 = vmul.f32 %v1543_v23, %v582_v2 }
 0x324   : > { %v678_v5 = vmul.f32 %v665_v3, %v665_v3  ;;  %v653_v0 = vmul.f32 0.9, %v640_v4 }
 0x325   : > { %v587_v6 = vpop.permute.xlu1 %586 }
 0x326   : > { %v691_v7 = vmul.f32 %v678_v5, %v678_v5  ;;  %v666_v8 = vadd.f32 0.1, %v653_v0  ;;  %v641_v14 = vmul.f32 %v1548_v30, %v587_v6 }
 0x328   : > { %v704_v17 = vmul.f32 %v691_v7, %v1443_v9  ;;  %v679_v20 = vmul.f32 %v666_v8, %v666_v8  ;;  %v654_v26 = vmul.f32 0.9, %v641_v14 }
 0x329   : > { %v592_v28 = vpop.permute.xlu1 %591 }
 0x32a   : > { %717 = vst [vmem:[%s1612_s20] sm:$0xff] %v704_v17  ;;  %v692_v11 = vmul.f32 %v679_v20, %v679_v20  ;;  %v667_v23 = vadd.f32 0.1, %v654_v26  ;;  %v642_v29 = vmul.f32 %v1553_v34, %v592_v28 }
 0x32c   : > { %v705_v31 = vmul.f32 %v692_v11, %v1446_v10  ;;  %v680_v32 = vmul.f32 %v667_v23, %v667_v23  ;;  %v655_v30 = vmul.f32 0.9, %v642_v29 }
 0x32d   : > { %v597_v33 = vpop.permute.xlu1 %596 }
 0x32e   : > { %718 = vst [vmem:[%s1612_s20 + $0x8] sm:$0xff] %v705_v31  ;;  %v693_v9 = vmul.f32 %v680_v32, %v680_v32  ;;  %v668_v35 = vadd.f32 0.1, %v655_v30  ;;  %v643_v36 = vmul.f32 %v1559_v38, %v597_v33 }
 0x330   : > { %v706_v37 = vmul.f32 %v693_v9, %v1454_v12  ;;  %v681_v39 = vmul.f32 %v668_v35, %v668_v35  ;;  %v656_v40 = vmul.f32 0.9, %v643_v36 }
 0x331   : > { %v602_v41 = vpop.permute.xlu1 %601 }
 0x332   : > { %719 = vst [vmem:[%s1612_s20 + $0x10] sm:$0xff] %v706_v37  ;;  %v694_v43 = vmul.f32 %v681_v39, %v681_v39  ;;  %v669_v34 = vadd.f32 0.1, %v656_v40  ;;  %v644_v10 = vmul.f32 %v1565_v42, %v602_v41 }
 0x334   : > { %v707_v44 = vmul.f32 %v694_v43, %v1457_v13  ;;  %v682_v45 = vmul.f32 %v669_v34, %v669_v34  ;;  %v657_v47 = vmul.f32 0.9, %v644_v10 }
 0x335   : > { %v607_v49 = vpop.permute.xlu1 %606 }
 0x336   : > { %720 = vst [vmem:[%s1612_s20 + $0x18] sm:$0xff] %v707_v44  ;;  %v695_v48 = vmul.f32 %v682_v45, %v682_v45  ;;  %v670_v38 = vadd.f32 0.1, %v657_v47  ;;  %v645_v12 = vmul.f32 %v1571_v46, %v607_v49 }
 0x338   : > { %v708_v53 = vmul.f32 %v695_v48, %v1464_v15  ;;  %v683_v55 = vmul.f32 %v670_v38, %v670_v38  ;;  %v658_v50 = vmul.f32 0.9, %v645_v12 }
 0x339   : > { %v612_v57 = vpop.permute.xlu1 %611 }
 0x33a   : > { %721 = vst [vmem:[%s1612_s20 + $0x20] sm:$0xff] %v708_v53  ;;  %v696_v60 = vmul.f32 %v683_v55, %v683_v55  ;;  %v671_v42 = vadd.f32 0.1, %v658_v50  ;;  %v646_v13 = vmul.f32 %v1577_v51, %v612_v57 }
 0x33c   : > { %v709_v61 = vmul.f32 %v696_v60, %v1467_v16  ;;  %v684_v62 = vmul.f32 %v671_v42, %v671_v42  ;;  %v659_v63 = vmul.f32 0.9, %v646_v13 }
 0x33d   : > { %v617_v1 = vpop.permute.xlu1 %616 }
 0x33e   : > { %722 = vst [vmem:[%s1612_s20 + $0x28] sm:$0xff] %v709_v61  ;;  %v697_v2 = vmul.f32 %v684_v62, %v684_v62  ;;  %v672_v46 = vadd.f32 0.1, %v659_v63  ;;  %v647_v15 = vmul.f32 %v1583_v56, %v617_v1 }
 0x340   : > { %v710_v3 = vmul.f32 %v697_v2, %v1474_v18  ;;  %v685_v4 = vmul.f32 %v672_v46, %v672_v46  ;;  %v660_v5 = vmul.f32 0.9, %v647_v15 }
 0x341   : > { %v622_v0 = vpop.permute.xlu1 %621 }
 0x342   : > { %723 = vst [vmem:[%s1612_s20 + $0x30] sm:$0xff] %v710_v3  ;;  %v698_v6 = vmul.f32 %v685_v4, %v685_v4  ;;  %v673_v51 = vadd.f32 0.1, %v660_v5  ;;  %v648_v16 = vmul.f32 %v1588_v52, %v622_v0 }
 0x344   : > { %v711_v7 = vmul.f32 %v698_v6, %v1477_v19  ;;  %v686_v8 = vmul.f32 %v673_v51, %v673_v51  ;;  %v661_v14 = vmul.f32 0.9, %v648_v16 }
 0x345   : > { %v627_v17 = vpop.permute.xlu0 %626 }
 0x346   : > { %724 = vst [vmem:[%s1612_s20 + $0x38] sm:$0xff] %v711_v7  ;;  %v699_v20 = vmul.f32 %v686_v8, %v686_v8  ;;  %v674_v56 = vadd.f32 0.1, %v661_v14  ;;  %v649_v18 = vmul.f32 %v1593_v58, %v627_v17 }
 0x348   : > { %v712_v26 = vmul.f32 %v699_v20, %v1484_v21  ;;  %v687_v28 = vmul.f32 %v674_v56, %v674_v56  ;;  %v662_v11 = vmul.f32 0.9, %v649_v18 }
 0x349   : > { %v632_v23 = vpop.permute.xlu1 %631 }
 0x34a   : > { %725 = vst [vmem:[%s1612_s20 + $0x40] sm:$0xff] %v712_v26  ;;  %v700_v29 = vmul.f32 %v687_v28, %v687_v28  ;;  %v675_v52 = vadd.f32 0.1, %v662_v11  ;;  %v650_v19 = vmul.f32 %v1598_v54, %v632_v23 }
 0x34c   : > { %v713_v31 = vmul.f32 %v700_v29, %v1487_v22  ;;  %v688_v32 = vmul.f32 %v675_v52, %v675_v52  ;;  %v663_v30 = vmul.f32 0.9, %v650_v19 }
 0x34d   : > { %v637_v33 = vpop.permute.xlu0 %636 }
 0x34e   : > { %726 = vst [vmem:[%s1612_s20 + $0x48] sm:$0xff] %v713_v31  ;;  %v701_v58 = vmul.f32 %v688_v32, %v688_v32  ;;  %v676_v21 = vadd.f32 0.1, %v663_v30  ;;  %v651_v9 = vmul.f32 %v1603_v59, %v637_v33 }
 0x350   : > { %v714_v35 = vmul.f32 %v701_v58, %v1494_v24  ;;  %v689_v36 = vmul.f32 %v676_v21, %v676_v21  ;;  %v664_v37 = vmul.f32 0.9, %v651_v9 }
 0x352   : > { %727 = vst [vmem:[%s1612_s20 + $0x50] sm:$0xff] %v714_v35  ;;  %v702_v39 = vmul.f32 %v689_v36, %v689_v36  ;;  %v677_v54 = vadd.f32 0.1, %v664_v37 }
 0x354   : > { %v715_v22 = vmul.f32 %v702_v39, %v1497_v25  ;;  %v690_v40 = vmul.f32 %v677_v54, %v677_v54 }
 0x356   : > { %728 = vst [vmem:[%s1612_s20 + $0x58] sm:$0xff] %v715_v22  ;;  %v703_v41 = vmul.f32 %v690_v40, %v690_v40  ;;  %737 = sbr.rel (!%p1722_p4) target bundleno = 886 (0x376), region = 40 }
 0x358   : > { %v716_v43 = vmul.f32 %v703_v41, %v1504_v27 }
 0x35a   : > { %729 = vst [vmem:[%s1612_s20 + $0x60] sm:$0xff] %v716_v43 }
 0x35b   : > { %s1732_s14 = smov (!%p740_p13, %s739_s14), 13 }
 0x35c   : > { %s1653_s19 = sshll.u32 %s1732_s14, 7 }
 0x35d   : > { %s744_s26 = ssub.s32 1664, %s1653_s19 }
 0x35e   : > { %745 = vsyncadd %s731_s23, %s744_s26  ;;  %p853_p5 = scmp.ne.s32.totalorder %s1653_s19, 0  ;;  %s860_s21 = smul.u32 1664, %s1315_s13 }
 0x35f   : > { %s750_s30 = sshll.u32 %s1612_s20, 4  ;;  %s1276_s8 = smov [#allocation7]   ;;  %s1666_s30 = int_to_ptr.vmem [resolvable:$true] %s750_s30 }
 0x360   : > { %s1664_s5 = scalar_lea.hbm %s1713_s2, %s860_s21  ;;  %s1196_s6 = scalar_lea.vmem %s1666_s30, %s1653_s19 }
 0x361   : > { %p1197_p1 = scmp.ne.s32.totalorder %s1666_s30, %s1196_s6  ;;  %s1200_s16 = sshll.u32 %s1276_s8, 4  ;;  %s1201_s16 = int_to_ptr.vmem [resolvable:$false] %s1200_s16 }
 0x362   : > { %s1202_s13 = scalar_lea.vmem %s1201_s16, 3328  ;;  %p1203_p3 = scmp.lt.s32.totalorder %s1666_s30, %s1201_s16 }
 0x363   : > { %p1198_p0 = pnand %p1197_p1, %p853_p5  ;;  %p1204_p8 = scmp.lt.s32.totalorder %s1202_s13, %s1196_s6 }
 0x365   : > { %p1199_p7 = pneg %p1198_p0  ;;  %p1205_p9 = por %p1204_p8, %p1203_p3 }
 0x367   : > { %p1206_p6 = pnand %p1205_p9, %p1199_p7 }
 0x369   : > { %1209 = shalt.err (!%p1206_p6)
}
 0x36a   : > { %s1210_s17 = scalar_lea.hbm %s1664_s5, %s1653_s19  ;;  %s1214_s28 = scalar_lea.hbm %s1713_s2, 3200 }
 0x36b   : > { %p1211_p11 = scmp.ne.s32.totalorder %s1664_s5, %s1210_s17  ;;  %p1215_p10 = scmp.lt.s32.totalorder %s1664_s5, %s1713_s2 }
 0x36c   : > { %p1216_p4 = scmp.lt.s32.totalorder %s1214_s28, %s1210_s17 }
 0x36d   : > { %p1212_p12 = pnand %p1211_p11, %p853_p5 }
 0x36e   : > { %p1217_p13 = por %p1216_p4, %p1215_p10 }
 0x36f   : > { %p1213_p2 = pneg %p1212_p12 }
 0x371   : > { %p1218_p1 = pnand %p1217_p13, %p1213_p2 }
 0x373   : > { %1221 = shalt.err (!%p1218_p1)
}
 0x374   : > { %s1277_s7 = smov 128   ;;  %s1278_s14 = smov 8  }
 0x375   : > { %756 = dma.vmem_to_hbm [thread:$0]  (%p853_p5), %s1666_s30, %s1653_s19, %s1664_s5, %s731_s23, %s1277_s7, %s1277_s7, %s1278_s14  }
 0x376 PF: > { %s765_s26 = sand.u32 1, %s1252_s9   ;;  %p1723_p0 = scmp.ne.s32.totalorder %s1719_s22, 0 }
 0x377   : > { %p1724_p7 = scmp.ge.s32.totalorder %s1264_s12, 2  ;;  %s766_s21 = scalar_lea.sflag [#allocation4], %s765_s26 }
 0x379   : > { %p1033_p3 = pnand %p1724_p7, %p1723_p0 }
 0x37b   : > { %p1034_p8 = pneg %p1033_p3 }
 0x37d   : > { %1247 = dma.done.wait (%p1034_p8), %s766_s21, 1664  }
 0x37e   : > { %1249 = vsyncadd (%p1034_p8), %s766_s21, 4294965632  ;;  %p16_p9 = scmp.ge.s32.totalorder %s1319_s15, 4   ;;  %s1725_s9 = smov %s1256_s10 }
 0x37f   : > { %s1726_s10 = smov %s1260_s11  ;;  %s1727_s11 = smov %s1331_s18 }
 0x380   : > { %s1728_s12 = smov %s1319_s15  ;;  %18 = sbr.rel (!%p16_p9) target bundleno = 6 (0x6), region = 77 }
 0x385   :  { %771 = vsyncpa [#allocation3], 1 }
 0x386   :  { %773 = vsyncpa [#allocation3 + $0x1], 1 }
 0x387   :  { %774 = vsyncpa [#allocation6], 1 }
 0x388   :  { %775 = vsyncpa [#allocation4], 1 }
 0x389   :  { %777 = vsyncpa [#allocation4 + $0x1], 1 }

</bundles_post_ra>
